<compile_context>
chip_gen: v7x
topology: tpu7x:2x2x1
jax: 0.10.0
libtpu: 0.0.40
codegen_flags: <defaults>
</compile_context>

<pallas_src>
import functools

import jax
import jax.numpy as jnp
from jax.experimental import pallas as pl
from jax.experimental.pallas import tpu as pltpu

_EPS = 1e-12  # F.normalize default eps


def _round_up(x, m):
    return (x + m - 1) // m * m


# --------------------------------------------------------------------------- #
# Kernel
# --------------------------------------------------------------------------- #
def trajsimi_kernel(x_ref, w1_ref, b1_ref, w2_ref, b2_ref, o_ref):
    x = x_ref[...]                                                      # (tb, nin_p)
    # Linear 1 + ReLU (MXU matmul, f32 accumulate; biases kept f32)
    h = jnp.dot(x, w1_ref[...], preferred_element_type=jnp.float32)
    h = jnp.maximum(h + b1_ref[...], 0.0)
    # Linear 2 (cast activation to the weight dtype -> supports bf16 operand path)
    z = jnp.dot(h.astype(w2_ref.dtype), w2_ref[...],
                preferred_element_type=jnp.float32) + b2_ref[...]
    # L2 normalize along feature dim (PyTorch dim=1): z / max(||z||, eps)
    #   == z * rsqrt(max(||z||^2, eps^2)); rsqrt runs on the EUP slot.
    # Padded z columns are exactly zero (zero-padded weights/biases), so the
    # sum of squares over nin_p equals the sum over the true nin.
    ss = jnp.sum(z * z, axis=1, keepdims=True)
    inv = jax.lax.rsqrt(jnp.maximum(ss, _EPS * _EPS))
    out = z * inv
    # Output block's last dim is the true nin (== full array dim); drop padding
    # on the store instead of a post-kernel slice.
    o_ref[...] = out[:, : o_ref.shape[1]].astype(o_ref.dtype)


# --------------------------------------------------------------------------- #
# Parameter prep (runs ONCE, outside the per-call jitted path)
# --------------------------------------------------------------------------- #
def prepare_params(w1_t, b1, w2_t, b2, dtype=jnp.float32):
    """Zero-pad feature dims to a multiple of 128 and (optionally) cast weights.

    w*_t: (nin, nin) pre-transposed (in x out). Biases stay f32 for accuracy.
    Call once and cache the result; do not re-pad per forward call.
    """
    nin = w1_t.shape[0]
    nin_p = _round_up(nin, 128)
    pad = nin_p - nin
    if pad:
        w1_t = jnp.pad(w1_t, ((0, pad), (0, pad)))
        w2_t = jnp.pad(w2_t, ((0, pad), (0, pad)))
        b1 = jnp.pad(b1, (0, pad))
        b2 = jnp.pad(b2, (0, pad))
    w1_t = w1_t.astype(dtype)
    w2_t = w2_t.astype(dtype)
    return w1_t, b1.reshape(1, nin_p).astype(jnp.float32), \
           w2_t, b2.reshape(1, nin_p).astype(jnp.float32)


# --------------------------------------------------------------------------- #
# Forward wrapper
# --------------------------------------------------------------------------- #
@functools.partial(jax.jit, static_argnames=("block_b",))
def trajsimi_regression(trajs, w1_tp, b1_p, w2_tp, b2_p, *, block_b=512):
    """trajs: (B, nin) f32; w*_tp/b*_p: outputs of prepare_params (padded to nin_p)."""
    B, nin = trajs.shape
    nin_p = w1_tp.shape[0]
    pad_f = nin_p - nin

    # Per-call x padding only (weights were padded once in prepare_params).
    x = jnp.pad(trajs, ((0, 0), (0, pad_f))) if pad_f else trajs
    if x.dtype != w1_tp.dtype:
        x = x.astype(w1_tp.dtype)

    # --- batch tile -----------------------------------------------------------
    # Multiple of 8 sublanes, no larger than (rounded-up) B; cap so the grid has
    # at least 2 parallel steps when B allows it (v7x: 2 TensorCores per chip).
    tb = min(_round_up(block_b, 8), _round_up(B, 8))
    if B > 8:
        tb = min(tb, _round_up(pl.cdiv(B, 2), 8))
    tb = max(tb, 8)
    grid = (pl.cdiv(B, tb),)   # partial last tile is masked on writeback

    # --- VMEM budget (bytes): weights+biases single-buffered, x/out double-buffered
    w_isz = jnp.dtype(w1_tp.dtype).itemsize
    x_isz = jnp.dtype(x.dtype).itemsize
    vmem_bytes = (
        2 * nin_p * nin_p * w_isz          # W1^T + W2^T (Buffered(1))
        + 2 * nin_p * 4                    # b1 + b2 (Buffered(1), f32)
        + 2 * tb * nin_p * x_isz           # x tile, double-buffered
        + 2 * tb * nin * 4                 # out tile, double-buffered (f32)
        + (8 << 20)                        # headroom for compiler internal scratch
    )
    vmem_limit = int(min(max(vmem_bytes, 32 << 20), 100 << 20))
    # TODO(synk): for nin >= ~1792 in f32 on v7x (64 MiB/TC VMEM) switch to
    # bf16 weights or add an N/K "arbitrary" grid axis instead of keeping full
    # (nin_p, nin_p) weight blocks resident.

    cost = pl.CostEstimate(
        flops=4 * B * nin_p * nin_p,                      # two matmuls, 2 flop/MAC
        transcendentals=B,                                # one rsqrt per row
        bytes_accessed=(B * nin_p * x_isz + B * nin * 4
                        + 2 * nin_p * nin_p * w_isz + 2 * nin_p * 4),
    )

    out = pl.pallas_call(
        trajsimi_kernel,
        out_shape=jax.ShapeDtypeStruct((B, nin), jnp.float32),
        grid_spec=pltpu.PrefetchScalarGridSpec(
            num_scalar_prefetch=0,
            grid=grid,
            in_specs=[
                pl.BlockSpec((tb, nin_p), lambda i: (i, 0)),                  # x tile
                pl.BlockSpec((nin_p, nin_p), lambda i: (0, 0),
                             pipeline_mode=pl.Buffered(1)),                   # W1^T
                pl.BlockSpec((1, nin_p), lambda i: (0, 0),
                             pipeline_mode=pl.Buffered(1)),                   # b1
                pl.BlockSpec((nin_p, nin_p), lambda i: (0, 0),
                             pipeline_mode=pl.Buffered(1)),                   # W2^T
                pl.BlockSpec((1, nin_p), lambda i: (0, 0),
                             pipeline_mode=pl.Buffered(1)),                   # b2
            ],
            # Output block last dim == true nin (== full array dim): un-padding
            # happens on the store, no post-kernel slice / extra HBM pass.
            out_specs=pl.BlockSpec((tb, nin), lambda i: (i, 0)),
        ),
        compiler_params=pltpu.CompilerParams(
            dimension_semantics=("parallel",),
            vmem_limit_bytes=vmem_limit,
        ),
        cost_estimate=cost,
    )(x, w1_tp, b1_p, w2_tp, b2_p)

    return out


def reference(trajs, w1_t, b1, w2_t, b2):
    h = jnp.maximum(trajs @ w1_t + b1, 0.0)
    z = h @ w2_t + b2
    norm = jnp.sqrt(jnp.sum(z * z, axis=1, keepdims=True))
    return z / jnp.maximum(norm, _EPS)


if __name__ == "__main__":
    key = jax.random.PRNGKey(0)
    B, nin = 16, 32            # small smoke-test shapes (padding/overhead dominated)
    k_x, k_w1, k_b1, k_w2, k_b2 = jax.random.split(key, 5)

    # Deterministic parameter init (mimics nn.Linear uniform(-1/sqrt(nin), 1/sqrt(nin)))
    bound = 1.0 / jnp.sqrt(jnp.float32(nin))
    trajs = jax.random.normal(k_x, (B, nin), dtype=jnp.float32)
    w1 = jax.random.uniform(k_w1, (nin, nin), jnp.float32, -bound, bound)   # (out, in)
    b1 = jax.random.uniform(k_b1, (nin,), jnp.float32, -bound, bound)
    w2 = jax.random.uniform(k_w2, (nin, nin), jnp.float32, -bound, bound)   # (out, in)
    b2 = jax.random.uniform(k_b2, (nin,), jnp.float32, -bound, bound)

    # Pre-transpose once so kernel computes x @ W^T + b == x @ w_t + b,
    # and pad/cast once outside the per-call path.
    w1_t, w2_t = w1.T, w2.T
    w1_tp, b1_p, w2_tp, b2_p = prepare_params(w1_t, b1, w2_t, b2, dtype=jnp.float32)

    out = trajsimi_regression(trajs, w1_tp, b1_p, w2_tp, b2_p, block_b=512)
    out = jax.block_until_ready(out)

    ref = reference(trajs, w1_t, b1, w2_t, b2)
    assert out.shape == (B, nin)
    assert jnp.allclose(out, ref, atol=1e-5, rtol=1e-5), "mismatch vs JAX reference"
    print("KERNEL_OK")
</pallas_src>

<mosaic_0001>
module attributes {stable_mosaic.version = 11 : i64} {
  func.func @trajsimi_kernel(%arg0: i32, %arg1: memref<8x128xf32, #tpu.memory_space<vmem>>, %arg2: memref<128x128xf32, #tpu.memory_space<vmem>>, %arg3: memref<1x128xf32, #tpu.memory_space<vmem>>, %arg4: memref<128x128xf32, #tpu.memory_space<vmem>>, %arg5: memref<1x128xf32, #tpu.memory_space<vmem>>, %arg6: memref<8x32xf32, #tpu.memory_space<vmem>>) attributes {dimension_semantics = [#tpu.dimension_semantics<parallel>], iteration_bounds = array<i64: 2>, scalar_prefetch = 0 : i64, scratch_operands = 0 : i64, tpu.core_type = #tpu.core_type<tc>, window_params = [{transform_indices = @transform_0, window_bounds = array<i64: 8, 128>}, {pipeline_mode = #tpu.pipeline_mode<synchronous>, transform_indices = @transform_1, window_bounds = array<i64: 128, 128>}, {pipeline_mode = #tpu.pipeline_mode<synchronous>, transform_indices = @transform_2, window_bounds = array<i64: 1, 128>}, {pipeline_mode = #tpu.pipeline_mode<synchronous>, transform_indices = @transform_3, window_bounds = array<i64: 128, 128>}, {pipeline_mode = #tpu.pipeline_mode<synchronous>, transform_indices = @transform_4, window_bounds = array<i64: 1, 128>}, {transform_indices = @transform_5, window_bounds = array<i64: 8, 32>}]} {
    %c0 = arith.constant 0 : index
    %c0_0 = arith.constant 0 : index
    %0 = vector.load %arg1[%c0, %c0_0] : memref<8x128xf32, #tpu.memory_space<vmem>>, vector<8x128xf32>
    %c0_1 = arith.constant 0 : index
    %c0_2 = arith.constant 0 : index
    %1 = vector.load %arg2[%c0_1, %c0_2] : memref<128x128xf32, #tpu.memory_space<vmem>>, vector<128x128xf32>
    %cst = arith.constant dense<0.000000e+00> : vector<8x128xf32>
    %2 = tpu.matmul %0, %1, %cst {dimension_numbers = #tpu.dot_dimension_numbers<[1], [0], [0], [1], [0, 0, 1, 1], [], []>} : vector<8x128xf32>, vector<128x128xf32>, vector<8x128xf32> -> vector<8x128xf32>
    %c0_3 = arith.constant 0 : index
    %c0_4 = arith.constant 0 : index
    %3 = vector.load %arg3[%c0_3, %c0_4] : memref<1x128xf32, #tpu.memory_space<vmem>>, vector<1x128xf32>
    %4 = vector.broadcast %3 : vector<1x128xf32> to vector<8x128xf32>
    %5 = arith.addf %2, %4 : vector<8x128xf32>
    %cst_5 = arith.constant 0.000000e+00 : f32
    %6 = vector.broadcast %cst_5 : f32 to vector<8x128xf32>
    %7 = arith.maximumf %5, %6 : vector<8x128xf32>
    %c0_6 = arith.constant 0 : index
    %c0_7 = arith.constant 0 : index
    %8 = vector.load %arg4[%c0_6, %c0_7] : memref<128x128xf32, #tpu.memory_space<vmem>>, vector<128x128xf32>
    %cst_8 = arith.constant dense<0.000000e+00> : vector<8x128xf32>
    %9 = tpu.matmul %7, %8, %cst_8 {dimension_numbers = #tpu.dot_dimension_numbers<[1], [0], [0], [1], [0, 0, 1, 1], [], []>} : vector<8x128xf32>, vector<128x128xf32>, vector<8x128xf32> -> vector<8x128xf32>
    %c0_9 = arith.constant 0 : index
    %c0_10 = arith.constant 0 : index
    %10 = vector.load %arg5[%c0_9, %c0_10] : memref<1x128xf32, #tpu.memory_space<vmem>>, vector<1x128xf32>
    %11 = vector.broadcast %10 : vector<1x128xf32> to vector<8x128xf32>
    %12 = arith.addf %9, %11 : vector<8x128xf32>
    %13 = arith.mulf %12, %12 : vector<8x128xf32>
    %cst_11 = arith.constant dense<0.000000e+00> : vector<8xf32>
    %14 = vector.multi_reduction <add>, %13, %cst_11 [1] : vector<8x128xf32> to vector<8xf32>
    %15 = vector.shape_cast %14 : vector<8xf32> to vector<8x1xf32>
    %cst_12 = arith.constant 1.000000e-24 : f32
    %16 = vector.broadcast %cst_12 : f32 to vector<8x1xf32>
    %17 = arith.maximumf %15, %16 : vector<8x1xf32>
    %18 = math.rsqrt %17 : vector<8x1xf32>
    %19 = vector.broadcast %18 : vector<8x1xf32> to vector<8x128xf32>
    %20 = arith.mulf %12, %19 : vector<8x128xf32>
    %21 = vector.extract_strided_slice %20 {offsets = [0, 0], sizes = [8, 32], strides = [1, 1]} : vector<8x128xf32> to vector<8x32xf32>
    %c0_13 = arith.constant 0 : index
    %c0_14 = arith.constant 0 : index
    %22 = vector.load %arg6[%c0_13, %c0_14] : memref<8x32xf32, #tpu.memory_space<vmem>>, vector<8x32xf32>
    tpu.vector_store %arg6[%c0_13, %c0_14], %21 {strides = array<i32>} : memref<8x32xf32, #tpu.memory_space<vmem>>, vector<8x32xf32>,
    return
  }
  func.func @transform_0(%arg0: i32) -> (i32, i32) {
    %c0_i32 = arith.constant 0 : i32
    %c0_i32_0 = arith.constant 0 : i32
    return %arg0, %c0_i32 : i32, i32
  }
  func.func @transform_1(%arg0: i32) -> (i32, i32) {
    %c0_i32 = arith.constant 0 : i32
    %c0_i32_0 = arith.constant 0 : i32
    %c0_i32_1 = arith.constant 0 : i32
    return %c0_i32, %c0_i32_0 : i32, i32
  }
  func.func @transform_2(%arg0: i32) -> (i32, i32) {
    %c0_i32 = arith.constant 0 : i32
    %c0_i32_0 = arith.constant 0 : i32
    %c0_i32_1 = arith.constant 0 : i32
    return %c0_i32, %c0_i32_0 : i32, i32
  }
  func.func @transform_3(%arg0: i32) -> (i32, i32) {
    %c0_i32 = arith.constant 0 : i32
    %c0_i32_0 = arith.constant 0 : i32
    %c0_i32_1 = arith.constant 0 : i32
    return %c0_i32, %c0_i32_0 : i32, i32
  }
  func.func @transform_4(%arg0: i32) -> (i32, i32) {
    %c0_i32 = arith.constant 0 : i32
    %c0_i32_0 = arith.constant 0 : i32
    %c0_i32_1 = arith.constant 0 : i32
    return %c0_i32, %c0_i32_0 : i32, i32
  }
  func.func @transform_5(%arg0: i32) -> (i32, i32) {
    %c0_i32 = arith.constant 0 : i32
    %c0_i32_0 = arith.constant 0 : i32
    return %arg0, %c0_i32 : i32, i32
  }
}

</mosaic_0001>

<bundles_post_ra>
// kernel: trajsimi_regression.1
= control target key start
LH: loop header
LB: loop body
LE: loop exit
PB: predicated region body
PF: predicated region fallthrough
CT: control target
= control target key end

     0   :  { %10 = vsyncpa [#allocation3], 0  ;;  %s1136_s0 = inlined_call_operand.vmem [shape: f32[16,128], index: 0, kind: input, shape index: {}]   ;;  %s1137_s1 = inlined_call_operand.hbm [shape: f32[128,128], index: 1, kind: input, shape index: {}]   ;;  %s1138_s2 = inlined_call_operand.vmem [shape: f32[1,128], index: 2, kind: input, shape index: {}]   ;;  %s1139_s3 = inlined_call_operand.hbm [shape: f32[128,128], index: 3, kind: input, shape index: {}]   ;;  %s1140_s4 = inlined_call_operand.vmem [shape: f32[1,128], index: 4, kind: input, shape index: {}]   ;;  %s1141_s5 = inlined_call_operand.hbm [shape: f32[16,32], index: 5, kind: output, shape index: {}]  }
   0x1   :  { %11 = vsyncpa [#allocation6], 0 }
   0x2   :  { %12 = vsyncpa [#allocation4], 0 }
   0x3   :  { %14 = vsyncpa [#allocation4 + $0x1], 0  ;;  %s942_s18 = smov 0   ;;  %s944_s19 = smov 0  }
   0x4   :  { %s946_s20 = smov 0   ;;  %s948_s21 = smov 0  }
   0x5 LB: > { %s963_s22 = sadd.s32 4294967295, %s902_s21   ;;  %s541_s23 = sadd.s32 4294967294, %s902_s21   ;;  %s902_s21 = sphi %s948_s21, %s1159_s21   ;;  %s898_s20 = sphi %s946_s20, %s1158_s20   ;;  %s894_s19 = sphi %s944_s19, %s1157_s19   ;;  %s890_s18 = sphi %s942_s18, %s1156_s18  }
   0x6   : > { %s967_s24 = sadd.s32 1, %s902_s21   ;;  %s137_s25 = sadd.s32 1, %s898_s20 }
   0x7   : > { %s134_s26 = ssub.s32 %s902_s21, %s967_s24  ;;  %p147_p0 = scmp.ne.s32.totalorder %s898_s20, %s894_s19 }
   0x8   : > { %p135_p1 = scmp.eq.s32.totalorder %s134_s26, 0  ;;  %p148_p2 = scmp.eq.s32.totalorder %s963_s22, 1 }
   0x9   : > { %p153_p3 = scmp.ne.s32.totalorder %s894_s19, %s890_s18  ;;  %p154_p4 = scmp.eq.s32.totalorder %s541_s23, 1 }
   0xa   : > { %s978_s27 = scalar_select %p135_p1, %s898_s20, %s137_s25  }
   0xb   : > { %p980_p5 = por %p148_p2, %p147_p0  ;;  %p984_p6 = por %p154_p4, %p153_p3 }
   0xc   : > { %p542_p7 = scmp.ge.s32.totalorder %s902_s21, 1  ;;  %p161_p8 = scmp.lt.s32.totalorder %s902_s21, 3 }
   0xd   : > { %s1145_s28 = scalar_select %p980_p5, 1, 0 }
   0xe   : > { %s1146_s29 = scalar_select %p984_p6, 1, 0 }
   0xf   : > { %p1142_p9 = scmp.eq.s32.totalorder %s963_s22, 0  ;;  %p991_p10 = pnand %p542_p7, %p161_p8 }
  0x10   : > { %s904_s6 = smov [#allocation2]   ;;  %s905_s9 = smov [#allocation5]  }
  0x11   : > { %s1147_s30 = scalar_select %p991_p10, 1, 0 }
  0x12   : > { %s173_s7 = sshll.u32 %s904_s6, 4  ;;  %p719_p11 = pneg %p991_p10  ;;  %s174_s7 = int_to_ptr.vmem [resolvable:$true] %s173_s7 }
  0x13   : > { %s189_s10 = sshll.u32 %s905_s9, 4  ;;  %s776_s13 = scalar_lea.hbm %s1137_s1, 2048  ;;  %s1003_s10 = int_to_ptr.vmem [resolvable:$true] %s189_s10 }
  0x14   : > { %p999_p12 = pnand %p1142_p9, %p719_p11  ;;  %p777_p13 = scmp.ne.s32.totalorder %s1137_s1, %s776_s13 }
  0x15   : > { %p783_p3 = scmp.lt.u32.totalorder %s776_s13, %s1137_s1 }
  0x16   : > { %p778_p0 = pneg %p999_p12 }
  0x18   : > { %p779_p1 = pnand %p778_p0, %p777_p13 }
  0x1a   : > { %p780_p2 = pneg %p779_p1 }
  0x1c   : > { %p785_p4 = pnand %p783_p3, %p780_p2 }
  0x1e   : > { %788 = shalt.err (!%p785_p4)
}
  0x1f   : > { %s789_s23 = scalar_lea.vmem %s174_s7, 2048  ;;  %p797_p9 = scmp.lt.s32.totalorder %s174_s7, %s174_s7 }
  0x20   : > { %p790_p7 = scmp.ne.s32.totalorder %s174_s7, %s789_s23  ;;  %p798_p6 = scmp.lt.s32.totalorder %s789_s23, %s789_s23 }
  0x22   : > { %p792_p8 = pnand %p790_p7, %p778_p0  ;;  %p799_p5 = por %p798_p6, %p797_p9 }
  0x24   : > { %p793_p11 = pneg %p792_p8 }
  0x26   : > { %p800_p10 = pnand %p799_p5, %p793_p11 }
  0x28   : > { %803 = shalt.err (!%p800_p10)
}
  0x29   : > { %s906_s25 = smov 128   ;;  %s907_s26 = smov 8  }
  0x2a   : > { %722 = dma.hbm_to_vmem [thread:$0]  (!%p999_p12), %s1137_s1, 2048, %s174_s7, [#allocation3], %s906_s25, %s906_s25, %s907_s26  }
  0x2b   : > { %s804_s13 = scalar_lea.hbm %s1139_s3, 2048 }
  0x2c   : > { %p805_p13 = scmp.ne.s32.totalorder %s1139_s3, %s804_s13  ;;  %p811_p9 = scmp.lt.u32.totalorder %s804_s13, %s1139_s3 }
  0x2e   : > { %p807_p5 = pnand %p805_p13, %p778_p0 }
  0x30   : > { %p808_p6 = pneg %p807_p5 }
  0x32   : > { %p813_p10 = pnand %p811_p9, %p808_p6 }
  0x34   : > { %816 = shalt.err (!%p813_p10)
}
  0x35   : > { %s817_s7 = scalar_lea.vmem %s1003_s10, 2048  ;;  %p825_p4 = scmp.lt.s32.totalorder %s1003_s10, %s1003_s10 }
  0x36   : > { %p818_p1 = scmp.ne.s32.totalorder %s1003_s10, %s817_s7  ;;  %p826_p7 = scmp.lt.s32.totalorder %s817_s7, %s817_s7 }
  0x38   : > { %p820_p2 = pnand %p818_p1, %p778_p0  ;;  %p827_p8 = por %p826_p7, %p825_p4 }
  0x3a   : > { %p821_p3 = pneg %p820_p2 }
  0x3c   : > { %p828_p11 = pnand %p827_p8, %p821_p3 }
  0x3e   : > { %831 = shalt.err (!%p828_p11)
}
  0x3f   : > { %725 = dma.hbm_to_vmem [thread:$0]  (!%p999_p12), %s1139_s3, 2048, %s1003_s10, [#allocation6], %s906_s25, %s906_s25, %s907_s26  }
  0x40   : > { %p1149_p13 = scmp.ne.s32.totalorder %s1147_s30, 0 }
  0x41   : > { %p1150_p5 = scmp.eq.s32.totalorder (!%p1149_p13), %s963_s22, 0 }
  0x42   : > { %215 = sbr.rel (%p1149_p13) target bundleno = 716 (0x2cc), region = 40 }
  0x49   : > { %877 = dma.done.wait (%p1150_p5), [#allocation3], 2048   ;;  %p1151_p0 = pmov %p1150_p5 }
  0x4b   : > { %879 = vsyncadd (%p1151_p0), [#allocation3], 4294965248  ;;  %p1152_p6 = pmov %p1151_p0 }
  0x4c   : > { %p1153_p9 = pmov %p1151_p0 }
  0x4d   : > { %881 = dma.done.wait (%p1152_p6), [#allocation6], 2048  }
  0x4e   : > { %883 = vsyncadd (%p1153_p9), [#allocation6], 4294965248  ;;  %v908_v0 = vmov 0.0|0.0   ;;  %vm909_vm0 = vmmov 0   ;;  %v910_v1 = vmov 0.0   ;;  %v251_v2 = vld [vmem:[#allocation2] sm:$0xff] }
  0x4f   : > { %661 = vmatprep.subr.bf16.mxu0 %v908_v0  ;;  %623 = vmatprep.mubr.msk.f32.mxu0 %vm909_vm0, %v910_v1  ;;  %v252_v3 = vld [vmem:[#allocation2 + $0x8] sm:$0xff]  ;;  %v253_v4 = vld [vmem:[#allocation2 + $0x10] sm:$0xff]  ;;  %v254_v6 = vld [vmem:[#allocation2 + $0x18] sm:$0xff]  ;;  %p246_p12 = scmp.lt.s32.totalorder %s963_s22, 1  ;;  %s243_s14 = sand.u32 1, %s894_s19   ;;  %vm444_vm1 = vcmask 261120  }
  0x50   : > { %685 = vmatprep.subr.bf16.mxu1 %v908_v0  ;;  %658 = vmatprep.mubr.msk.f32.mxu1 %vm909_vm0, %v910_v1  ;;  %v662_v5 = vpack.c.bf16 %v252_v3, %v251_v2  ;;  %v665_v7 = vpack.c.bf16 %v254_v6, %v253_v4  ;;  %v255_v8 = vld [vmem:[#allocation2 + $0x20] sm:$0xff]  ;;  %v256_v9 = vld [vmem:[#allocation2 + $0x28] sm:$0xff]  ;;  %v347_v12 = vld [vmem:[#allocation5 + $0x10] sm:$0xff]  ;;  %s549_s15 = sshll.u32 %s243_s14, 3  ;;  %s554_s16 = sshll.u32 %s963_s22, 7 }
  0x51   : > { %v345_v10 = vld [vmem:[#allocation5] sm:$0xff]  ;;  %v346_v11 = vld [vmem:[#allocation5 + $0x8] sm:$0xff]  ;;  %v348_v13 = vld [vmem:[#allocation5 + $0x18] sm:$0xff]  ;;  %v668_v14 = vpack.c.bf16 %v256_v9, %v255_v8  ;;  %s247_s30 = scalar_select %p246_p12, %s963_s22, 1 }
  0x52   : > { %663 = vmatpush3.bf16.msra.mxu0 %v662_v5  ;;  %v686_v15 = vpack.c.bf16 %v346_v11, %v345_v10  ;;  %v257_v16 = vld [vmem:[#allocation2 + $0x30] sm:$0xff]  ;;  %v258_v17 = vld [vmem:[#allocation2 + $0x38] sm:$0xff]  ;;  %v689_v18 = vpack.c.bf16 %v348_v13, %v347_v12  ;;  %v349_v19 = vld [vmem:[#allocation5 + $0x20] sm:$0xff]  ;;  %s245_s17 = scalar_lea.vmem [#allocation7], %s549_s15  ;;  %p1154_p1 = scmp.ne.s32.totalorder %s1145_s28, 0 }
  0x53   : > { %664 = vmatprep.subr.bf16.mxu0 %v908_v0  ;;  %v350_v20 = vld [vmem:[#allocation5 + $0x28] sm:$0xff]  ;;  %v671_v21 = vpack.c.bf16 %v258_v17, %v257_v16  ;;  %v259_v22 = vld [vmem:[#allocation2 + $0x40] sm:$0xff]  ;;  %v351_v25 = vld [vmem:[#allocation5 + $0x30] sm:$0xff]  ;;  %s550_s8 = sshll.u32 %s247_s30, 3  ;;  %s460_s7 = sshll.u32 %s245_s17, 4  ;;  %s1096_s7 = int_to_ptr.vmem [resolvable:$true] %s460_s7 }
  0x54   : > { %687 = vmatpush3.bf16.msra.mxu1 %v686_v15  ;;  %v260_v23 = vld [vmem:[#allocation2 + $0x48] sm:$0xff]  ;;  %v692_v24 = vpack.c.bf16 %v350_v20, %v349_v19  ;;  %v352_v26 = vld [vmem:[#allocation5 + $0x38] sm:$0xff]  ;;  %v261_v28 = vld [vmem:[#allocation2 + $0x50] sm:$0xff]  ;;  %s249_s26 = scalar_lea.vmem %s1136_s0, %s550_s8  ;;  %s1094_s30 = scalar_lea.hbm %s1141_s5, %s554_s16 }
  0x55   : > { %688 = vmatprep.subr.bf16.mxu1 %v908_v0  ;;  %v674_v27 = vpack.c.bf16 %v260_v23, %v259_v22  ;;  %v262_v29 = vld [vmem:[#allocation2 + $0x58] sm:$0xff]  ;;  %v695_v30 = vpack.c.bf16 %v352_v26, %v351_v25  ;;  %v353_v31 = vld [vmem:[#allocation5 + $0x40] sm:$0xff]  ;;  %v354_v32 = vld [vmem:[#allocation5 + $0x48] sm:$0xff]  ;;  %s447_s8 = scalar_lea.sflag [#allocation4], %s243_s14  ;;  %s832_s10 = scalar_lea.vmem %s1096_s7, 128 }
  0x56   : > { %666 = vmatpush3.bf16.msra.mxu0 %v665_v7  ;;  %v677_v33 = vpack.c.bf16 %v262_v29, %v261_v28  ;;  %v263_v34 = vld [vmem:[#allocation2 + $0x60] sm:$0xff]  ;;  %v264_v35 = vld [vmem:[#allocation2 + $0x68] sm:$0xff]  ;;  %v698_v36 = vpack.c.bf16 %v354_v32, %v353_v31  ;;  %v355_v37 = vld [vmem:[#allocation5 + $0x50] sm:$0xff]  ;;  %p833_p10 = scmp.ne.s32.totalorder %s1096_s7, %s832_s10  ;;  %s911_s22 = smov [#allocation7]  }
  0x57   : > { %667 = vmatprep.subr.bf16.mxu0 %v908_v0  ;;  %v356_v38 = vld [vmem:[#allocation5 + $0x58] sm:$0xff]  ;;  %v680_v39 = vpack.c.bf16 %v264_v35, %v263_v34  ;;  %v265_v40 = vld [vmem:[#allocation2 + $0x70] sm:$0xff]  ;;  %v357_v43 = vld [vmem:[#allocation5 + $0x60] sm:$0xff]  ;;  %s836_s25 = sshll.u32 %s911_s22, 4  ;;  %s837_s25 = int_to_ptr.vmem [resolvable:$false] %s836_s25 }
  0x58   : > { %690 = vmatpush3.bf16.msra.mxu1 %v689_v18  ;;  %v266_v41 = vld [vmem:[#allocation2 + $0x78] sm:$0xff]  ;;  %v701_v42 = vpack.c.bf16 %v356_v38, %v355_v37  ;;  %v358_v44 = vld [vmem:[#allocation5 + $0x68] sm:$0xff]  ;;  %v250_v47 = vld [vmem:[%s249_s26] sm:$0xff]  ;;  %p834_p2 = pnand %p833_p10, %p1154_p1  ;;  %s838_s26 = scalar_lea.vmem %s837_s25, 256 }
  0x59   : > { %691 = vmatprep.subr.bf16.mxu1 %v908_v0  ;;  %v683_v45 = vpack.c.bf16 %v266_v41, %v265_v40  ;;  %v704_v46 = vpack.c.bf16 %v358_v44, %v357_v43  ;;  %v359_v48 = vld [vmem:[#allocation5 + $0x70] sm:$0xff]  ;;  %v360_v49 = vld [vmem:[#allocation5 + $0x78] sm:$0xff]  ;;  %v551_v51 = vld [vmem:[%s1138_s2] ss:$0 sm:$0xff]  ;;  %p839_p4 = scmp.lt.s32.totalorder %s1096_s7, %s837_s25  ;;  %p840_p7 = scmp.lt.s32.totalorder %s838_s26, %s832_s10 }
  0x5a   : > { %669 = vmatpush3.bf16.msra.mxu0 %v668_v14  ;;  %v707_v50 = vpack.c.bf16 %v360_v49, %v359_v48  ;;  %v552_v56 = vld [vmem:[%s1140_s4] ss:$0 sm:$0xff]  ;;  %p835_p3 = pneg %p834_p2 }
  0x5b   : > { %670 = vmatprep.subr.bf16.mxu0 %v908_v0  ;;  %p841_p8 = por %p840_p7, %p839_p4 }
  0x5c   : > { %693 = vmatpush3.bf16.msra.mxu1 %v692_v24 }
  0x5d   : > { %694 = vmatprep.subr.bf16.mxu1 %v908_v0  ;;  %p842_p11 = pnand %p841_p8, %p835_p3 }
  0x5e   : > { %672 = vmatpush3.bf16.msra.mxu0 %v671_v21 }
  0x5f   : > { %673 = vmatprep.subr.bf16.mxu0 %v908_v0 }
  0x60   : > { %696 = vmatpush3.bf16.msra.mxu1 %v695_v30 }
  0x61   : > { %697 = vmatprep.subr.bf16.mxu1 %v908_v0 }
  0x62   : > { %675 = vmatpush3.bf16.msra.mxu0 %v674_v27 }
  0x63   : > { %676 = vmatprep.subr.bf16.mxu0 %v908_v0 }
  0x64   : > { %699 = vmatpush3.bf16.msra.mxu1 %v698_v36 }
  0x65   : > { %700 = vmatprep.subr.bf16.mxu1 %v908_v0 }
  0x66   : > { %678 = vmatpush3.bf16.msra.mxu0 %v677_v33 }
  0x67   : > { %679 = vmatprep.subr.bf16.mxu0 %v908_v0 }
  0x68   : > { %702 = vmatpush3.bf16.msra.mxu1 %v701_v42 }
  0x69   : > { %703 = vmatprep.subr.bf16.mxu1 %v908_v0 }
  0x6a   : > { %681 = vmatpush3.bf16.msra.mxu0 %v680_v39 }
  0x6b   : > { %682 = vmatprep.subr.bf16.mxu0 %v908_v0 }
  0x6c   : > { %705 = vmatpush3.bf16.msra.mxu1 %v704_v46 }
  0x6d   : > { %706 = vmatprep.subr.bf16.mxu1 %v908_v0 }
  0x6e   : > { %684 = vmatpush3.bf16.msra.mxu0 %v683_v45 }
  0x70   : > { %708 = vmatpush3.bf16.msra.mxu1 %v707_v50 }
  0x71   : > { %624 = vmatmul.mubr.f32.vlgmr.msra.gmra.mrb[0].mxu0 %v250_v47 }
 0x144   : > { %v340_v52 = vpop.f32.mrb[0].mxu0 }
 0x145   : > { %v341_v53 = vadd.f32 %v551_v51, %v340_v52  ;;  %v625_v54 = vpop.f32.mrb[1].mxu0 }
 0x147   : > { %v344_v55 = vmax.f32 %v341_v53, 0.0 }
 0x149   : > { %659 = vmatmul.mubr.f32.vlgmr.msra.gmra.mrb[0].mxu1 %v344_v55 }
 0x21c   : > { %v434_v57 = vpop.f32.mrb[0].mxu1 }
 0x21d   : > { %v435_v58 = vadd.f32 %v552_v56, %v434_v57  ;;  %v660_v59 = vpop.f32.mrb[1].mxu1 }
 0x21f   : > { %v438_v60 = vmul.f32 %v435_v58, %v435_v58 }
 0x221   : > { %439 = vadd.xlane.f32.xlu0 %v438_v60 }
 0x2ae   : > { %v440_v61 = vpop.xlane.xlu0 %439 }
 0x2af   : > { %v441_v62 = vmax.f32 %v440_v61, 1e-24 }
 0x2b1   : > { %774 = vrsqrt.f32 %v441_v62 }
 0x2bb   : > { %v775_v63 = vpop.eup %774 }
 0x2bc   : > { %v443_v0 = vmul.f32 %v775_v63, %v435_v58 }
 0x2be   : > { %445 = vst.msk [vmem:[%s245_s17] sm:$0xff] %vm444_vm1, %v443_v0 }
 0x2bf   : > { %845 = shalt.err (!%p842_p11)
}
 0x2c0   : > { %s846_s9 = scalar_lea.hbm %s1094_s30, 128  ;;  %s850_s13 = scalar_lea.hbm %s1141_s5, 256 }
 0x2c1   : > { %p847_p13 = scmp.ne.s32.totalorder %s1094_s30, %s846_s9  ;;  %p851_p6 = scmp.lt.u32.totalorder %s1094_s30, %s1141_s5 }
 0x2c2   : > { %p852_p9 = scmp.lt.u32.totalorder %s850_s13, %s846_s9  ;;  %p854_p10 = scmp.lt.u32.totalorder %s846_s9, %s1094_s30 }
 0x2c3   : > { %p848_p5 = pnand %p847_p13, %p1154_p1 }
 0x2c4   : > { %p853_p12 = por %p852_p9, %p851_p6 }
 0x2c5   : > { %p849_p0 = pneg %p848_p5 }
 0x2c6   : > { %p855_p2 = por %p854_p10, %p853_p12 }
 0x2c8   : > { %p856_p3 = pnand %p855_p2, %p849_p0 }
 0x2ca   : > { %859 = shalt.err (!%p856_p3)
}
 0x2cb   : > { %717 = dma.vmem_to_hbm [thread:$0]  (%p1154_p1), %s1096_s7, 128, %s1094_s30, %s447_s8  }
 0x2cc PF: > { %p734_p4 = scmp.ge.s32.totalorder %s902_s21, 2  ;;  %s472_s16 = sand.u32 1, %s890_s18  }
 0x2cd   : > { %p1155_p7 = scmp.ne.s32.totalorder %s1146_s29, 0  ;;  %s473_s17 = scalar_lea.sflag [#allocation4], %s472_s16 }
 0x2cf   : > { %p727_p8 = pnand %p734_p4, %p1155_p7 }
 0x2d1   : > { %885 = dma.done.wait (!%p727_p8), %s473_s17, 128  }
 0x2d2   : > { %887 = vsyncadd (!%p727_p8), %s473_s17, 4294967168  ;;  %p17_p11 = scmp.ge.s32.totalorder %s967_s24, 4   ;;  %s1156_s18 = smov %s894_s19 }
 0x2d3   : > { %s1157_s19 = smov %s898_s20  ;;  %s1158_s20 = smov %s978_s27 }
 0x2d4   : > { %s1159_s21 = smov %s967_s24  ;;  %19 = sbr.rel (!%p17_p11) target bundleno = 5 (0x5), region = 84 }
 0x2db   :  { %478 = vsyncpa [#allocation3], 1 }
 0x2dc   :  { %480 = vsyncpa [#allocation3 + $0x1], 1 }
 0x2dd   :  { %481 = vsyncpa [#allocation6], 1 }
 0x2de   :  { %482 = vsyncpa [#allocation4], 1 }
 0x2df   :  { %484 = vsyncpa [#allocation4 + $0x1], 1 }

</bundles_post_ra>
